<compile_context>
chip_gen: v5e
topology: v5e:2x2
jax: 0.10.0
libtpu: 0.0.40
codegen_flags: <defaults>
</compile_context>

<pallas_src>
import jax
import jax.numpy as jnp
from jax.experimental import pallas as pl
from jax.experimental.pallas import tpu as pltpu

# ----------------------------- model configuration -----------------------------
INPUT_DIM = 32      # input_dim
HIDDEN = 32         # decoder/encoder hidden width
LATENT = 16         # latent_dim
C_DIM = 4           # c_dim
C_PAD = 8           # c padded to 8 lanes / 8 weight rows (sublane aligned, zero pad)
INIT_LOGVAR = -3.0  # init_logvar (GLOBAL_LEARNABLE variance init)
BATCH = 16

# --- packed parameter slab (136, 32): every row offset is a multiple of 8 -------
_W1Y_OFF = 0        # encoder layer1, Y part     (32, 32)  rows   0:32
_W1C_OFF = 32       # encoder layer1, c part     ( 8, 32)  rows  32:40 (data 32:36, pad 36:40 = 0)
_WHEADS_OFF = 40    # fused [wmu | wlv]          (32, 32)  rows  40:72
_WDZ_OFF = 72       # decoder shared, z part     (16, 32)  rows  72:88
_WDC_OFF = 88       # decoder shared, c part     ( 8, 32)  rows  88:96 (data 88:92, pad 92:96 = 0)
_WM_OFF = 96        # decoder mean head          (32, 32)  rows  96:128
_BIAS_OFF = 128     # rows 128..135: [b1, bmu||blv, bd, bm, glv, 0, 0, 0]
_P_ROWS = 136

# --- packed activation input lanes: [Y | c(pad to 8) | eps | pad] -> 64 lanes ----
_I_Y = 0
_I_C = INPUT_DIM                  # 32
_I_EPS = INPUT_DIM + C_PAD        # 40
_I_END = _I_EPS + LATENT          # 56
IN_W = 64

# --- packed output lanes: [mu_z | logvar_z | loc | scale | pad] -> 128 lanes -----
_O_MU_Z = 0
_O_LV_Z = LATENT                  # 16
_O_LOC = 2 * LATENT               # 32
_O_SCALE = _O_LOC + INPUT_DIM     # 64
_O_PAD = _O_SCALE + INPUT_DIM     # 96
OUT_W = 128                       # full vreg of lanes -> one unmasked store


def cvae_kernel(yce_ref, p_ref, out_ref):
    # ------------- unpack the single activation slab (static lane slices) -------------
    yce = yce_ref[...]                      # (B, 64)
    Y = yce[:, _I_Y:_I_C]                   # (B, 32)
    c8 = yce[:, _I_C:_I_EPS]                # (B, 8)  lanes 4:8 are zero
    eps = yce[:, _I_EPS:_I_END]             # (B, 16)

    # ------------- unpack the parameter slab (sublane-aligned ref slices) -------------
    w1y = p_ref[_W1Y_OFF:_W1Y_OFF + INPUT_DIM, :]        # (32, 32)
    w1c = p_ref[_W1C_OFF:_W1C_OFF + C_PAD, :]            # ( 8, 32) rows 4:8 unused (c pad lanes are 0)
    wheads = p_ref[_WHEADS_OFF:_WHEADS_OFF + HIDDEN, :]  # (32, 32) = [wmu | wlv]
    wdz = p_ref[_WDZ_OFF:_WDZ_OFF + LATENT, :]           # (16, 32)
    wdc = p_ref[_WDC_OFF:_WDC_OFF + C_PAD, :]            # ( 8, 32) rows 4:8 unused
    wm = p_ref[_WM_OFF:_WM_OFF + HIDDEN, :]              # (32, 32)

    bias_rows = p_ref[_BIAS_OFF:_BIAS_OFF + 8, :]        # one aligned (8, 32) load
    b1 = bias_rows[0:1, :]       # (1, HIDDEN)
    bheads = bias_rows[1:2, :]   # (1, 2*LATENT) = [bmu | blv]
    bd = bias_rows[2:3, :]       # (1, HIDDEN)
    bm = bias_rows[3:4, :]       # (1, INPUT_DIM)
    glv = bias_rows[4:5, :]      # (1, INPUT_DIM) global learnable logvar

    # ---------------- Encoder: Linear(D+C -> H) + ReLU, fused (mu, logvar) head --------
    h1 = jnp.maximum(
        jnp.dot(Y, w1y, preferred_element_type=jnp.float32)
        + jnp.dot(c8, w1c, preferred_element_type=jnp.float32)
        + b1, 0.0)                                            # non_linear=True
    heads = jnp.dot(h1, wheads, preferred_element_type=jnp.float32) + bheads
    mu_z = heads[:, :LATENT]
    logvar_z = heads[:, LATENT:]

    # ---------------- Reparameterise (clips kept; isnan/isinf guards are no-ops for
    # finite inputs and were removed) ----------------
    mu_c = jnp.clip(mu_z, -10.0, 10.0)
    lv_c = jnp.clip(logvar_z, -10.0, 10.0)
    std = jnp.exp(0.5 * lv_c) + 1e-6
    z = mu_c + eps * std

    # ---------------- FlexibleDecoder: shared Linear(L+C -> H) + ReLU, mean head -------
    h2 = jnp.maximum(
        jnp.dot(z, wdz, preferred_element_type=jnp.float32)
        + jnp.dot(c8, wdc, preferred_element_type=jnp.float32)
        + bd, 0.0)                                            # non_linear=True
    mu_out = jnp.clip(
        jnp.dot(h2, wm, preferred_element_type=jnp.float32) + bm, -10.0, 10.0)

    # GLOBAL_LEARNABLE variance: batch-invariant -> compute on the (1, D) row,
    # broadcast only when assembling the output row.
    scale_row = jnp.exp(0.5 * jnp.clip(glv, -10.0, 5.0)) + 1e-6
    scale = jnp.broadcast_to(scale_row, mu_out.shape)

    # ---------------- single lane-dense (B, 128) row, one unmasked store ---------------
    out_ref[...] = jnp.concatenate(
        [heads,                                               # lanes   0:32  [mu_z | logvar_z]
         mu_out,                                              # lanes  32:64  loc
         scale,                                               # lanes  64:96  scale
         jnp.zeros((mu_out.shape[0], OUT_W - _O_PAD), jnp.float32)],  # lanes 96:128 pad
        axis=1)


# ----------------------------- parameters -----------------------------
def make_params(key):
    """Deterministic parameter init (shapes follow the PyTorch module __init__)."""
    ks = jax.random.split(key, 8)
    s = 0.1
    return {
        # Encoder: Linear(D+C -> H), split into Y-part and c-part
        "w1y": jax.random.normal(ks[0], (INPUT_DIM, HIDDEN), jnp.float32) * s,
        "w1c": jax.random.normal(ks[1], (C_DIM, HIDDEN), jnp.float32) * s,
        "b1": jnp.zeros((1, HIDDEN), jnp.float32),
        # Encoder heads: Linear(H -> L)
        "wmu": jax.random.normal(ks[2], (HIDDEN, LATENT), jnp.float32) * s,
        "bmu": jnp.zeros((1, LATENT), jnp.float32),
        "wlv": jax.random.normal(ks[3], (HIDDEN, LATENT), jnp.float32) * s,
        "blv": jnp.zeros((1, LATENT), jnp.float32),
        # Decoder shared layer: Linear(L+C -> H), split into z-part and c-part
        "wdz": jax.random.normal(ks[4], (LATENT, HIDDEN), jnp.float32) * s,
        "wdc": jax.random.normal(ks[5], (C_DIM, HIDDEN), jnp.float32) * s,
        "bd": jnp.zeros((1, HIDDEN), jnp.float32),
        # Decoder mean head: Linear(H -> D)
        "wm": jax.random.normal(ks[6], (HIDDEN, INPUT_DIM), jnp.float32) * s,
        "bm": jnp.zeros((1, INPUT_DIM), jnp.float32),
        # Global learnable logvar ((input_dim,) in torch; kept 2-D here)
        "glv": jnp.full((1, INPUT_DIM), INIT_LOGVAR, jnp.float32),
    }


def pack_params(p):
    """Pack ALL parameters (weights + biases + global logvar) into one slab (done once)."""
    def pad_rows(w, rows):
        return jnp.pad(w, ((0, rows - w.shape[0]), (0, 0)))

    slab = jnp.concatenate([
        p["w1y"],                                       # rows   0:32
        pad_rows(p["w1c"], C_PAD),                      # rows  32:40 (data 32:36)
        jnp.concatenate([p["wmu"], p["wlv"]], axis=1),  # rows  40:72
        p["wdz"],                                       # rows  72:88
        pad_rows(p["wdc"], C_PAD),                      # rows  88:96 (data 88:92)
        p["wm"],                                        # rows  96:128
        p["b1"],                                        # row 128
        jnp.concatenate([p["bmu"], p["blv"]], axis=1),  # row 129
        p["bd"],                                        # row 130
        p["bm"],                                        # row 131
        p["glv"],                                       # row 132
        jnp.zeros((3, HIDDEN), jnp.float32),            # rows 133:136 pad
    ], axis=0)
    assert slab.shape == (_P_ROWS, HIDDEN)
    return slab


# ----------------------------- forward wrapper -----------------------------
@jax.jit
def cvae_forward(Y, c, eps, p_slab):
    B = Y.shape[0]
    # Pad batch to a multiple of 8 (sublane) so any batch size works; slice back after.
    Bp = max(8, ((B + 7) // 8) * 8)
    if Bp != B:
        pad = Bp - B
        Y = jnp.pad(Y, ((0, pad), (0, 0)))
        c = jnp.pad(c, ((0, pad), (0, 0)))
        eps = jnp.pad(eps, ((0, pad), (0, 0)))

    # One lane-dense activation slab: [Y | c (padded to 8 lanes) | eps | pad] -> (Bp, 64).
    yce = jnp.concatenate([
        Y,
        jnp.pad(c, ((0, 0), (0, C_PAD - C_DIM))),
        eps,
        jnp.zeros((Bp, IN_W - _I_END), jnp.float32),
    ], axis=1)

    # Gridless pallas_call: whole problem (a few KiB) lives in VMEM, kernel runs once.
    packed = pl.pallas_call(
        cvae_kernel,
        out_shape=jax.ShapeDtypeStruct((Bp, OUT_W), jnp.float32),
        in_specs=[
            pl.BlockSpec(memory_space=pltpu.MemorySpace.VMEM),  # activation slab
            pl.BlockSpec(memory_space=pltpu.MemorySpace.VMEM),  # parameter slab
        ],
        out_specs=pl.BlockSpec(memory_space=pltpu.MemorySpace.VMEM),
    )(yce, p_slab)

    packed = packed[:B]
    return {
        "mu_z": packed[:, _O_MU_Z:_O_LV_Z],
        "logvar_z": packed[:, _O_LV_Z:_O_LOC],
        "Y_recon_loc": packed[:, _O_LOC:_O_SCALE],
        "Y_recon_scale": packed[:, _O_SCALE:_O_PAD],
    }


# ----------------------------- pure-JAX reference -----------------------------
def cvae_forward_ref(Y, c, eps, p):
    h1 = jnp.maximum(Y @ p["w1y"] + c @ p["w1c"] + p["b1"], 0.0)
    mu_z = h1 @ p["wmu"] + p["bmu"]
    logvar_z = h1 @ p["wlv"] + p["blv"]
    mu_c = jnp.clip(mu_z, -10.0, 10.0)
    lv_c = jnp.clip(logvar_z, -10.0, 10.0)
    std = jnp.exp(0.5 * lv_c) + 1e-6
    z = mu_c + eps * std
    h2 = jnp.maximum(z @ p["wdz"] + c @ p["wdc"] + p["bd"], 0.0)
    mu_out = jnp.clip(h2 @ p["wm"] + p["bm"], -10.0, 10.0)
    logvar_out = jnp.clip(jnp.broadcast_to(p["glv"], mu_out.shape), -10.0, 5.0)
    scale = jnp.exp(0.5 * logvar_out) + 1e-6
    return {"Y_recon_loc": mu_out, "Y_recon_scale": scale,
            "mu_z": mu_z, "logvar_z": logvar_z}


if __name__ == "__main__":
    key = jax.random.PRNGKey(0)
    k_p, k_y, k_c, k_eps = jax.random.split(key, 4)

    params = make_params(k_p)
    p_slab = pack_params(params)

    Y = jax.random.normal(k_y, (BATCH, INPUT_DIM), jnp.float32)
    c = jax.random.normal(k_c, (BATCH, C_DIM), jnp.float32)
    # eps supplies the randn_like used inside reparameterise (drawn once, outside,
    # to keep the RNG stream identical to the reference).
    eps = jax.random.normal(k_eps, (BATCH, LATENT), jnp.float32)

    out = cvae_forward(Y, c, eps, p_slab)
    jax.block_until_ready(out)

    ref = cvae_forward_ref(Y, c, eps, params)
    for name in ("mu_z", "logvar_z", "Y_recon_loc", "Y_recon_scale"):
        assert jnp.allclose(out[name], ref[name], atol=1e-5, rtol=1e-5), name

    # TODO(synk): torch.distributions.Normal construction (and its try/except
    # ValueError fallback) has no Pallas equivalent; the kernel returns loc/scale.
    print("KERNEL_OK")
</pallas_src>

<mosaic_0001>
module attributes {stable_mosaic.version = 11 : i64} {
  func.func @cvae_kernel(%arg0: memref<16x64xf32, #tpu.memory_space<vmem>>, %arg1: memref<136x32xf32, #tpu.memory_space<vmem>>, %arg2: memref<16x128xf32, #tpu.memory_space<vmem>>) attributes {dimension_semantics = [], scalar_prefetch = 0 : i64, scratch_operands = 0 : i64, tpu.core_type = #tpu.core_type<tc>} {
    %c0 = arith.constant 0 : index
    %c0_0 = arith.constant 0 : index
    %0 = vector.load %arg0[%c0, %c0_0] : memref<16x64xf32, #tpu.memory_space<vmem>>, vector<16x64xf32>
    %1 = vector.extract_strided_slice %0 {offsets = [0, 0], sizes = [16, 32], strides = [1, 1]} : vector<16x64xf32> to vector<16x32xf32>
    %2 = vector.extract_strided_slice %0 {offsets = [0, 32], sizes = [16, 8], strides = [1, 1]} : vector<16x64xf32> to vector<16x8xf32>
    %3 = vector.extract_strided_slice %0 {offsets = [0, 40], sizes = [16, 16], strides = [1, 1]} : vector<16x64xf32> to vector<16x16xf32>
    %c0_1 = arith.constant 0 : index
    %c0_2 = arith.constant 0 : index
    %4 = vector.load %arg1[%c0_1, %c0_2] : memref<136x32xf32, #tpu.memory_space<vmem>>, vector<32x32xf32>
    %c32 = arith.constant 32 : index
    %c0_3 = arith.constant 0 : index
    %5 = vector.load %arg1[%c32, %c0_3] : memref<136x32xf32, #tpu.memory_space<vmem>>, vector<8x32xf32>
    %c40 = arith.constant 40 : index
    %c0_4 = arith.constant 0 : index
    %6 = vector.load %arg1[%c40, %c0_4] : memref<136x32xf32, #tpu.memory_space<vmem>>, vector<32x32xf32>
    %c72 = arith.constant 72 : index
    %c0_5 = arith.constant 0 : index
    %7 = vector.load %arg1[%c72, %c0_5] : memref<136x32xf32, #tpu.memory_space<vmem>>, vector<16x32xf32>
    %c88 = arith.constant 88 : index
    %c0_6 = arith.constant 0 : index
    %8 = vector.load %arg1[%c88, %c0_6] : memref<136x32xf32, #tpu.memory_space<vmem>>, vector<8x32xf32>
    %c96 = arith.constant 96 : index
    %c0_7 = arith.constant 0 : index
    %9 = vector.load %arg1[%c96, %c0_7] : memref<136x32xf32, #tpu.memory_space<vmem>>, vector<32x32xf32>
    %c128 = arith.constant 128 : index
    %c0_8 = arith.constant 0 : index
    %10 = vector.load %arg1[%c128, %c0_8] : memref<136x32xf32, #tpu.memory_space<vmem>>, vector<8x32xf32>
    %11 = vector.extract_strided_slice %10 {offsets = [0, 0], sizes = [1, 32], strides = [1, 1]} : vector<8x32xf32> to vector<1x32xf32>
    %12 = vector.extract_strided_slice %10 {offsets = [1, 0], sizes = [1, 32], strides = [1, 1]} : vector<8x32xf32> to vector<1x32xf32>
    %13 = vector.extract_strided_slice %10 {offsets = [2, 0], sizes = [1, 32], strides = [1, 1]} : vector<8x32xf32> to vector<1x32xf32>
    %14 = vector.extract_strided_slice %10 {offsets = [3, 0], sizes = [1, 32], strides = [1, 1]} : vector<8x32xf32> to vector<1x32xf32>
    %15 = vector.extract_strided_slice %10 {offsets = [4, 0], sizes = [1, 32], strides = [1, 1]} : vector<8x32xf32> to vector<1x32xf32>
    %cst = arith.constant dense<0.000000e+00> : vector<16x32xf32>
    %16 = tpu.matmul %1, %4, %cst {dimension_numbers = #tpu.dot_dimension_numbers<[1], [0], [0], [1], [0, 0, 1, 1], [], []>} : vector<16x32xf32>, vector<32x32xf32>, vector<16x32xf32> -> vector<16x32xf32>
    %cst_9 = arith.constant dense<0.000000e+00> : vector<16x32xf32>
    %17 = tpu.matmul %2, %5, %cst_9 {dimension_numbers = #tpu.dot_dimension_numbers<[1], [0], [0], [1], [0, 0, 1, 1], [], []>} : vector<16x8xf32>, vector<8x32xf32>, vector<16x32xf32> -> vector<16x32xf32>
    %18 = arith.addf %16, %17 : vector<16x32xf32>
    %19 = vector.broadcast %11 : vector<1x32xf32> to vector<16x32xf32>
    %20 = arith.addf %18, %19 : vector<16x32xf32>
    %cst_10 = arith.constant 0.000000e+00 : f32
    %21 = vector.broadcast %cst_10 : f32 to vector<16x32xf32>
    %22 = arith.maximumf %20, %21 : vector<16x32xf32>
    %cst_11 = arith.constant dense<0.000000e+00> : vector<16x32xf32>
    %23 = tpu.matmul %22, %6, %cst_11 {dimension_numbers = #tpu.dot_dimension_numbers<[1], [0], [0], [1], [0, 0, 1, 1], [], []>} : vector<16x32xf32>, vector<32x32xf32>, vector<16x32xf32> -> vector<16x32xf32>
    %24 = vector.broadcast %12 : vector<1x32xf32> to vector<16x32xf32>
    %25 = arith.addf %23, %24 : vector<16x32xf32>
    %26 = vector.extract_strided_slice %25 {offsets = [0, 0], sizes = [16, 16], strides = [1, 1]} : vector<16x32xf32> to vector<16x16xf32>
    %27 = vector.extract_strided_slice %25 {offsets = [0, 16], sizes = [16, 16], strides = [1, 1]} : vector<16x32xf32> to vector<16x16xf32>
    %cst_12 = arith.constant -1.000000e+01 : f32
    %cst_13 = arith.constant 1.000000e+01 : f32
    %28 = vector.broadcast %cst_12 : f32 to vector<16x16xf32>
    %29 = arith.maximumf %28, %26 : vector<16x16xf32>
    %30 = vector.broadcast %cst_13 : f32 to vector<16x16xf32>
    %31 = arith.minimumf %30, %29 : vector<16x16xf32>
    %cst_14 = arith.constant -1.000000e+01 : f32
    %cst_15 = arith.constant 1.000000e+01 : f32
    %32 = vector.broadcast %cst_14 : f32 to vector<16x16xf32>
    %33 = arith.maximumf %32, %27 : vector<16x16xf32>
    %34 = vector.broadcast %cst_15 : f32 to vector<16x16xf32>
    %35 = arith.minimumf %34, %33 : vector<16x16xf32>
    %cst_16 = arith.constant 5.000000e-01 : f32
    %36 = vector.broadcast %cst_16 : f32 to vector<16x16xf32>
    %37 = arith.mulf %36, %35 : vector<16x16xf32>
    %38 = math.exp %37 : vector<16x16xf32>
    %cst_17 = arith.constant 9.99999997E-7 : f32
    %39 = vector.broadcast %cst_17 : f32 to vector<16x16xf32>
    %40 = arith.addf %38, %39 : vector<16x16xf32>
    %41 = arith.mulf %3, %40 : vector<16x16xf32>
    %42 = arith.addf %31, %41 : vector<16x16xf32>
    %cst_18 = arith.constant dense<0.000000e+00> : vector<16x32xf32>
    %43 = tpu.matmul %42, %7, %cst_18 {dimension_numbers = #tpu.dot_dimension_numbers<[1], [0], [0], [1], [0, 0, 1, 1], [], []>} : vector<16x16xf32>, vector<16x32xf32>, vector<16x32xf32> -> vector<16x32xf32>
    %cst_19 = arith.constant dense<0.000000e+00> : vector<16x32xf32>
    %44 = tpu.matmul %2, %8, %cst_19 {dimension_numbers = #tpu.dot_dimension_numbers<[1], [0], [0], [1], [0, 0, 1, 1], [], []>} : vector<16x8xf32>, vector<8x32xf32>, vector<16x32xf32> -> vector<16x32xf32>
    %45 = arith.addf %43, %44 : vector<16x32xf32>
    %46 = vector.broadcast %13 : vector<1x32xf32> to vector<16x32xf32>
    %47 = arith.addf %45, %46 : vector<16x32xf32>
    %cst_20 = arith.constant 0.000000e+00 : f32
    %48 = vector.broadcast %cst_20 : f32 to vector<16x32xf32>
    %49 = arith.maximumf %47, %48 : vector<16x32xf32>
    %cst_21 = arith.constant dense<0.000000e+00> : vector<16x32xf32>
    %50 = tpu.matmul %49, %9, %cst_21 {dimension_numbers = #tpu.dot_dimension_numbers<[1], [0], [0], [1], [0, 0, 1, 1], [], []>} : vector<16x32xf32>, vector<32x32xf32>, vector<16x32xf32> -> vector<16x32xf32>
    %51 = vector.broadcast %14 : vector<1x32xf32> to vector<16x32xf32>
    %52 = arith.addf %50, %51 : vector<16x32xf32>
    %cst_22 = arith.constant -1.000000e+01 : f32
    %cst_23 = arith.constant 1.000000e+01 : f32
    %53 = vector.broadcast %cst_22 : f32 to vector<16x32xf32>
    %54 = arith.maximumf %53, %52 : vector<16x32xf32>
    %55 = vector.broadcast %cst_23 : f32 to vector<16x32xf32>
    %56 = arith.minimumf %55, %54 : vector<16x32xf32>
    %cst_24 = arith.constant -1.000000e+01 : f32
    %cst_25 = arith.constant 5.000000e+00 : f32
    %57 = vector.broadcast %cst_24 : f32 to vector<1x32xf32>
    %58 = arith.maximumf %57, %15 : vector<1x32xf32>
    %59 = vector.broadcast %cst_25 : f32 to vector<1x32xf32>
    %60 = arith.minimumf %59, %58 : vector<1x32xf32>
    %cst_26 = arith.constant 5.000000e-01 : f32
    %61 = vector.broadcast %cst_26 : f32 to vector<1x32xf32>
    %62 = arith.mulf %61, %60 : vector<1x32xf32>
    %63 = math.exp %62 : vector<1x32xf32>
    %cst_27 = arith.constant 9.99999997E-7 : f32
    %64 = vector.broadcast %cst_27 : f32 to vector<1x32xf32>
    %65 = arith.addf %63, %64 : vector<1x32xf32>
    %66 = vector.shape_cast %65 : vector<1x32xf32> to vector<1x32xf32>
    %67 = vector.broadcast %66 : vector<1x32xf32> to vector<16x32xf32>
    %cst_28 = arith.constant 0.000000e+00 : f32
    %68 = vector.broadcast %cst_28 : f32 to vector<16x32xf32>
    %69 = tpu.concatenate %25, %56, %67, %68 in 1 : vector<16x32xf32>, vector<16x32xf32>, vector<16x32xf32>, vector<16x32xf32> -> vector<16x128xf32>
    %c0_29 = arith.constant 0 : index
    %c0_30 = arith.constant 0 : index
    %70 = vector.load %arg2[%c0_29, %c0_30] : memref<16x128xf32, #tpu.memory_space<vmem>>, vector<16x128xf32>
    tpu.vector_store %arg2[%c0_29, %c0_30], %69 {strides = array<i32>} : memref<16x128xf32, #tpu.memory_space<vmem>>, vector<16x128xf32>,
    return
  }
}

</mosaic_0001>

<bundles_post_ra>
// kernel: cvae_forward.1
= control target key start
LH: loop header
LB: loop body
LE: loop exit
PB: predicated region body
PF: predicated region fallthrough
CT: control target
= control target key end

     0   :  { %s313_s13 = smov 96   ;;  %vm36_vm0 = vcmask 64512   ;;  %vm64_vm1 = vcmask 261120   ;;  %s314_s7 = smov 24   ;;  %vm182_vm2 = vcmask 130048   ;;  %vm272_vm3 = vcmask 523264   ;;  %s433_s0 = inlined_call_operand.vmem [shape: f32[16,64], index: 0, kind: input, shape index: {}]   ;;  %s434_s1 = inlined_call_operand.vmem [shape: f32[136,32], index: 1, kind: input, shape index: {}]   ;;  %s435_s2 = inlined_call_operand.vmem [shape: f32[16,128], index: 2, kind: output, shape index: {}]  }
   0x1   :  { %v336_v0 = vld [vmem:[%s433_s0 + $0x8] sm:$0xff]  ;;  %v17_v1 = vld [vmem:[%s434_s1 + $0x20] sm:$0xff]  ;;  %v24_v2 = vld [vmem:[%s434_s1 + $0x58] sm:$0xff]  ;;  %s315_s12 = smov 88   ;;  %s317_s21 = smov 32   ;;  %vm275_vm4 = vcmask 785408  }
   0x2   :  { %34 = vrot.lane.b32.xlu0 %v336_v0, %s313_s13  ;;  %300 = vmatpush.msra.mxu1 %v17_v1  ;;  %v348_v3 = vld [vmem:[%s433_s0] sm:$0xff]  ;;  %v16_v4 = vld [vmem:[%s434_s1 + $0x18] sm:$0xff]  ;;  %v15_v5 = vld [vmem:[%s434_s1 + $0x10] sm:$0xff] }
   0x3   :  { %301 = vmatpush.msra.mxu3 %v24_v2  ;;  %56 = vmatpush.msra.mxu0 %v17_v1  ;;  %v14_v6 = vld [vmem:[%s434_s1 + $0x8] sm:$0xff]  ;;  %v13_v7 = vld [vmem:[%s434_s1] sm:$0xff]  ;;  %v20_v11 = vld [vmem:[%s434_s1 + $0x38] sm:$0xff] }
   0x4   :  { %81 = vmatpush.msrb.mxu1 %v16_v4  ;;  %v21_v10 = vld [vmem:[%s434_s1 + $0x40] sm:$0xff]  ;;  %v19_v12 = vld [vmem:[%s434_s1 + $0x30] sm:$0xff]  ;;  %v18_v13 = vld [vmem:[%s434_s1 + $0x28] sm:$0xff] }
   0x5   :  { %116 = vmatpush.msra.mxu2 %v21_v10  ;;  %v385_v15 = vld [vmem:[%s434_s1 + $0x80] sm:$0xff]  ;;  %v23_v41 = vld [vmem:[%s434_s1 + $0x50] sm:$0xff]  ;;  %v22_v42 = vld [vmem:[%s434_s1 + $0x48] sm:$0xff] }
   0x6   :  { %82 = vmatpush.msrb.mxu1 %v15_v5  ;;  %v92_v16 = vperm.slane %v385_v15, 0  ;;  %v97_v26 = vperm.slane %v385_v15, 1  ;;  %203 = vmatpush.msrb.mxu0 %v23_v41  ;;  %v28_v47 = vld [vmem:[%s434_s1 + $0x78] sm:$0xff]  ;;  %v27_v52 = vld [vmem:[%s434_s1 + $0x70] sm:$0xff]  ;;  %v26_v53 = vld [vmem:[%s434_s1 + $0x68] sm:$0xff]  ;;  %v212_v55 = vperm.slane %v385_v15, 2 }
   0x7   :  { %117 = vmatpush.msra.mxu2 %v20_v11  ;;  %236 = vmatpush.msrb.mxu3 %v28_v47  ;;  %v25_v54 = vld [vmem:[%s434_s1 + $0x60] sm:$0xff]  ;;  %s316_s1 = smov 64  }
   0x8   :  { %83 = vmatpush.msrb.mxu1 %v14_v6  ;;  %204 = vmatpush.msrb.mxu0 %v22_v42 }
   0x9   :  { %118 = vmatpush.msra.mxu2 %v19_v12  ;;  %237 = vmatpush.msrb.mxu3 %v27_v52 }
   0xa   :  { %32 = vrot.lane.b32.xlu0 %v348_v3, %s313_s13  ;;  %84 = vmatpush.msrb.mxu1 %v13_v7 }
   0xb   :  { %119 = vmatpush.msra.mxu2 %v18_v13  ;;  %238 = vmatpush.msrb.mxu3 %v26_v53 }
   0xd   :  { %174 = vmatpush.msrb.mxu2 %v24_v2  ;;  %239 = vmatpush.msrb.mxu3 %v25_v54  ;;  %v251_v2 = vmax.f32 %v385_v15, -10.0 }
  0x74   :  { %v35_v8 = vpop.permute.xlu0 %34 }
  0x75   :  { %285 = vmatmul.msk.f32.vlgmr.msra.gmra.mxu1 %vm36_vm0, %v35_v8  ;;  %293 = vmatmul.msk.f32.vlgmr.msra.gmra.mxu3 %vm36_vm0, %v35_v8 }
  0x7c   :  { %v33_v9 = vpop.permute.xlu0 %32 }
  0x7d   :  { %284 = vmatmul.msk.f32.vlgmr.msra.gmra.mxu0 %vm36_vm0, %v33_v9  ;;  %286 = vmatmul.msk.f32.vlgmr.msrb.gmra.mxu1 %vm64_vm1, %v348_v3 }
  0x85   :  { %287 = vmatmul.msk.f32.gmra.mxu1 %vm64_vm1, %v336_v0 }
  0xf2   :  { %v61_v14 = vpop.f32.mrf.mxu1 }
  0xf8   :  { %v179_v61 = vpop.f32.mrf.mxu3 }
  0xfa   :  { %v58_v17 = vpop.f32.mrf.mxu0  ;;  %v86_v18 = vpop.f32.mrf.mxu1 }
  0xfb   :  { %v87_v19 = vadd.f32 %v86_v18, %v58_v17 }
  0xfd   :  { %v93_v20 = vadd.f32 %v92_v16, %v87_v19 }
  0xff   :  { %v95_v21 = vmax.f32 %v93_v20, 0.0 }
 0x101   :  { %288 = vmatmul.msk.f32.vlgmr.msra.gmra.mxu2 %vm64_vm1, %v95_v21 }
 0x102   :  { %v89_v22 = vpop.f32.mrf.mxu1 }
 0x103   :  { %v90_v23 = vadd.f32 %v89_v22, %v61_v14 }
 0x105   :  { %v94_v24 = vadd.f32 %v92_v16, %v90_v23 }
 0x107   :  { %v96_v25 = vmax.f32 %v94_v24, 0.0 }
 0x109   :  { %289 = vmatmul.msk.f32.gmra.mxu2 %vm64_vm1, %v96_v25 }
 0x111   :  { %292 = vmatmul.msk.f32.vlgmr.msrb.gmra.mxu2 %vm36_vm0, %v33_v9  ;;  %v217_v9 = vperm.slane %v385_v15, 3 }
 0x184   :  { %v121_v27 = vpop.f32.mrf.mxu2 }
 0x185   :  { %v392_v28 = vadd.f32 %v121_v27, %v97_v26 }
 0x187   :  { %v290_v29 = vclamps-f32 %v392_v28, 10.0 }
 0x189   :  { %v131_v30 = vmul.f32 0.5, %v290_v29 }
 0x18b   :  { %v133_v31 = vmul.f32 1.442695, %v131_v30 }
 0x18c   :  { %v124_v32 = vpop.f32.mrf.mxu2 }
 0x18d   :  { %v395_v33 = vadd.f32 %v124_v32, %v97_v26  ;;  %307 = vpow2.f32 %v133_v31 }
 0x18f   :  { %v291_v34 = vclamps-f32 %v395_v33, 10.0 }
 0x191   :  { %v132_v35 = vmul.f32 0.5, %v291_v34 }
 0x193   :  { %v308_v36 = vpop.eup %307  ;;  %v135_v37 = vmul.f32 1.442695, %v132_v35 }
 0x194   :  { %v137_v38 = vadd.f32 1e-06, %v308_v36  ;;  %v176_v56 = vpop.f32.mrf.mxu2 }
 0x195   :  { %309 = vpow2.f32 %v135_v37 }
 0x196   :  { %141 = vrot.lane.b32.xlu1 %v137_v38, %s314_s7 }
 0x19b   :  { %v310_v39 = vpop.eup %309 }
 0x19c   :  { %v138_v40 = vadd.f32 1e-06, %v310_v39 }
 0x19e   :  { %143 = vrot.lane.b32.xlu1 %v138_v40, %s314_s7 }
 0x208   :  { %v142_v43 = vpop.permute.xlu1 %141 }
 0x209   :  { %v147_v44 = vmul.f32 %v142_v43, %v348_v3  ;;  %v252_v3 = vmin.f32 %v251_v2, 5.0 }
 0x20b   :  { %151 = vrot.lane.b32.xlu2 %v147_v44, %s315_s12  ;;  %v253_v4 = vmul.f32 0.5, %v252_v3 }
 0x20d   :  { %v254_v5 = vmul.f32 1.442695, %v253_v4 }
 0x20f   :  { %311 = vpow2.f32 %v254_v5 }
 0x210   :  { %v144_v45 = vpop.permute.xlu1 %143 }
 0x211   :  { %v148_v46 = vmul.f32 %v144_v45, %v336_v0 }
 0x213   :  { %153 = vrot.lane.b32.xlu2 %v148_v46, %s315_s12 }
 0x215   :  { %v312_v6 = vpop.eup %311 }
 0x216   :  { %v256_v7 = vadd.f32 1e-06, %v312_v6 }
 0x218   :  { %v257_v8 = vperm.slane %v256_v7, 4 }
 0x21b   :  { %267 = vrot.lane.b32.xlu2 %v257_v8, %s316_s1 }
 0x265   :  { %v152_v48 = vpop.permute.xlu2 %151 }
 0x266   :  { %v157_v49 = vadd.f32 %v290_v29, %v152_v48 }
 0x268   :  { %294 = vmatmul.msk.f32.vlgmr.msrb.gmra.mxu0 %vm182_vm2, %v157_v49 }
 0x26d   :  { %v154_v50 = vpop.permute.xlu2 %153 }
 0x26e   :  { %v158_v51 = vadd.f32 %v291_v34, %v154_v50 }
 0x270   :  { %295 = vmatmul.msk.f32.gmra.mxu0 %vm182_vm2, %v158_v51 }
 0x275   :  { %v268_v17 = vpop.permute.xlu2 %267 }
 0x2e5   :  { %v206_v57 = vpop.f32.mrf.mxu0 }
 0x2e6   :  { %v207_v58 = vadd.f32 %v206_v57, %v176_v56 }
 0x2e8   :  { %v213_v59 = vadd.f32 %v212_v55, %v207_v58 }
 0x2ea   :  { %v215_v60 = vmax.f32 %v213_v59, 0.0 }
 0x2ec   :  { %296 = vmatmul.msk.f32.vlgmr.msrb.gmra.mxu3 %vm64_vm1, %v215_v60 }
 0x2ed   :  { %v209_v62 = vpop.f32.mrf.mxu0 }
 0x2ee   :  { %v210_v63 = vadd.f32 %v209_v62, %v179_v61 }
 0x2f0   :  { %v214_v0 = vadd.f32 %v212_v55, %v210_v63 }
 0x2f2   :  { %v216_v1 = vmax.f32 %v214_v0, 0.0 }
 0x2f4   :  { %297 = vmatmul.msk.f32.gmra.mxu3 %vm64_vm1, %v216_v1 }
 0x36f   :  { %v241_v10 = vpop.f32.mrf.mxu3 }
 0x370   :  { %v242_v11 = vadd.f32 %v241_v10, %v217_v9 }
 0x372   :  { %v298_v12 = vclamps-f32 %v242_v11, 10.0 }
 0x374   :  { %260 = vrot.lane.b32.xlu0 %v298_v12, %s317_s21 }
 0x377   :  { %v244_v13 = vpop.f32.mrf.mxu3 }
 0x378   :  { %v245_v14 = vadd.f32 %v244_v13, %v217_v9 }
 0x37a   :  { %v299_v16 = vclamps-f32 %v245_v14, 10.0 }
 0x37c   :  { %262 = vrot.lane.b32.xlu1 %v299_v16, %s317_s21 }
 0x3e6   :  { %v261_v18 = vpop.permute.xlu0 %260 }
 0x3e7   :  { %v270_v19 = vsel %vm64_vm1, %v392_v28, %v261_v18 }
 0x3e8   :  { %v273_v20 = vsel %vm272_vm3, %v270_v19, %v268_v17 }
 0x3e9   :  { %v276_v15 = vsel %vm275_vm4, %v273_v20, 0.0 }
 0x3ea   :  { %278 = vst [vmem:[%s435_s2] sm:$0xff] %v276_v15 }
 0x3ee   :  { %v263_v21 = vpop.permute.xlu1 %262 }
 0x3ef   :  { %v271_v22 = vsel %vm64_vm1, %v395_v33, %v263_v21 }
 0x3f0   :  { %v274_v23 = vsel %vm272_vm3, %v271_v22, %v268_v17 }
 0x3f1   :  { %v277_v24 = vsel %vm275_vm4, %v274_v23, 0.0 }
 0x3f2   :  { %279 = vst [vmem:[%s435_s2 + $0x8] sm:$0xff] %v277_v24 }

</bundles_post_ra>
